<compile_context>
chip_gen: v7x
topology: tpu7x:2x2x1
jax: 0.10.0
libtpu: 0.0.40
codegen_flags: <defaults>
</compile_context>

<pallas_src>
import numpy as np
import jax
import jax.numpy as jnp
from jax.experimental import pallas as pl
from jax.experimental.pallas import tpu as pltpu


RESERVOIR_SIZE = 256     # N (multiple of 128 -> clean lane layout)
INPUT_DIM = 1            # forward does torch.mul(W_input, x) with scalar x
OUTPUT_DIM = 4
SEQ_LEN = 8
CONNECTIVITY = 0.1
SPECTRAL_RADIUS = 0.9
BIAS_SCALING = 0.5
INPUT_SCALING = 1.0

LANE = 128               # lane width; readout is padded to this


def _round_up(a, b):
    return ((a + b - 1) // b) * b


# --------------------------------------------------------------------------
# Pallas kernel: full ESN sequence (T steps) in ONE invocation (no grid).
#   - weights resident in VMEM (loaded once),
#   - reservoir state carried in vregs through a fully-unrolled T=8 loop,
#   - single batched readout matmul + single lane-dense store at the end.
# --------------------------------------------------------------------------
def _esn_seq_kernel(xs_ref,        # VMEM (T, 1)      f32 scalar inputs
                    state0_ref,    # VMEM (1, N)      f32 initial state
                    wt_ref,        # VMEM (N, N)      bf16 W^T
                    win_ref,       # VMEM (1, N)      f32 W_input row
                    wb_ref,        # VMEM (1, N)      f32 W_bias row
                    wout_t_ref,    # VMEM (N, O_pad)  bf16 W_out^T (padded)
                    state_out_ref, # VMEM (1, N)      f32 final state
                    outs_ref):     # VMEM (T, O_pad)  f32 all readouts
    T = xs_ref.shape[0]

    # Precompute the per-step input drive for the whole sequence in one
    # vectorized VPU pass: drive[t] = xs[t] * W_in + W_bias   -> (T, N).
    drive = xs_ref[...] * win_ref[...] + wb_ref[...]

    wt = wt_ref[...]                       # bf16 (N, N), loaded once
    state = state0_ref[...]                # f32 (1, N), lives in vregs

    states = []
    # T is small and static -> fully unrolled; state never touches VMEM.
    for t in range(T):
        rec = jnp.dot(state.astype(jnp.bfloat16), wt,
                      preferred_element_type=jnp.float32)        # MXU (1,N)
        state = jnp.tanh(drive[t:t + 1, :] + rec)                # VPU + EUP
        states.append(state)

    state_out_ref[...] = state

    # Deferred batched readout: one (T,N)@(N,O_pad) matmul, one unmasked
    # lane-dense (T, O_pad) store.
    all_states = jnp.concatenate(states, axis=0)                 # (T, N)
    outs_ref[...] = jnp.dot(all_states.astype(jnp.bfloat16), wout_t_ref[...],
                            preferred_element_type=jnp.float32)


def esn_forward_sequence(xs, state0, w, w_in, w_bias, w_out):
    """Run T consecutive ESN forward() steps in a single Pallas kernel.

    Args:
      xs:      (T,)   scalar input sequence.
      state0:  (N,)   initial reservoir state.
      w:       (N, N) reservoir matrix.
      w_in:    (N,)   input weights.
      w_bias:  (N,)   bias weights.
      w_out:   (O, N) readout matrix.
    Returns:
      outputs (T, O) and final reservoir state (N,).
    """
    T = int(xs.shape[0])
    N = int(w.shape[0])
    O = int(w_out.shape[0])
    O_pad = _round_up(max(O, LANE), LANE)     # lane-dense readout width

    xs_col = jnp.asarray(xs, jnp.float32).reshape(T, 1)
    state0_row = jnp.asarray(state0, jnp.float32).reshape(1, N)
    # bf16 weights => single-pass MXU matmuls; state / accumulation stay f32.
    w_t = jnp.asarray(w, jnp.float32).T.astype(jnp.bfloat16)        # (N, N)
    win_row = jnp.asarray(w_in, jnp.float32).reshape(1, N)
    wb_row = jnp.asarray(w_bias, jnp.float32).reshape(1, N)
    wout_t = (jnp.zeros((N, O_pad), jnp.float32)
              .at[:, :O].set(jnp.asarray(w_out, jnp.float32).T)
              .astype(jnp.bfloat16))                                 # (N, O_pad)

    vmem = pltpu.MemorySpace.VMEM
    final_state, outs = pl.pallas_call(
        _esn_seq_kernel,
        in_specs=[pl.BlockSpec(memory_space=vmem)] * 6,
        out_specs=(pl.BlockSpec(memory_space=vmem),
                   pl.BlockSpec(memory_space=vmem)),
        out_shape=(jax.ShapeDtypeStruct((1, N), jnp.float32),
                   jax.ShapeDtypeStruct((T, O_pad), jnp.float32)),
    )(xs_col, state0_row, w_t, win_row, wb_row, wout_t)

    return outs[:, :O], final_state[0]


# --------------------------------------------------------------------------
# Deterministic parameter generation (mirrors the __init__ matrix generators,
# without scipy: mask-based sparsity + spectral-radius normalisation).
# --------------------------------------------------------------------------
def generate_reservoir_matrix(size, density, spectral_radius, rng):
    mat = rng.standard_normal((size, size))
    mat = mat * (rng.random((size, size)) < density)
    largest_eig = np.max(np.abs(np.linalg.eigvals(mat)))
    return (mat * spectral_radius / largest_eig).astype(np.float32)


def generate_norm_sparse_matrix(rows, cols, density, scaling, rng):
    mat = rng.standard_normal((rows, cols))
    mat = mat * (rng.random((rows, cols)) < density)
    return np.squeeze(mat * scaling).astype(np.float32)


# --------------------------------------------------------------------------
# Pure-JAX f32 reference of the PyTorch forward() recurrence for verification
# --------------------------------------------------------------------------
def esn_reference(xs, state0, w, w_in, w_bias, w_out):
    def step(state, x):
        new_state = jnp.tanh(w_in * x + w_bias + w @ state)
        out = w_out @ new_state
        return new_state, out
    final_state, outs = jax.lax.scan(step, state0, xs)
    return outs, final_state


if __name__ == "__main__":
    N, O, T = RESERVOIR_SIZE, OUTPUT_DIM, SEQ_LEN
    rng = np.random.default_rng(0)

    W = generate_reservoir_matrix(N, CONNECTIVITY, SPECTRAL_RADIUS, rng)
    W_bias = generate_norm_sparse_matrix(N, 1, CONNECTIVITY, BIAS_SCALING, rng)
    W_input = generate_norm_sparse_matrix(N, INPUT_DIM, CONNECTIVITY,
                                          INPUT_SCALING, rng)
    # W_out is zeros in __init__ (set later by ridge regression); use a small
    # deterministic random readout here so the readout matmul is exercised.
    W_out = (0.1 * rng.standard_normal((O, N))).astype(np.float32)

    # Deterministic scalar input sequence (like predict() feeding x[i]).
    key = jax.random.PRNGKey(0)
    xs = jax.random.normal(key, (T,), dtype=jnp.float32)

    state0 = jnp.zeros((N,), dtype=jnp.float32)
    W_j = jnp.asarray(W)
    W_in_j = jnp.asarray(W_input)
    W_b_j = jnp.asarray(W_bias)
    W_out_j = jnp.asarray(W_out)

    # Single Pallas kernel invocation runs the whole T-step recurrence.
    outs_k, state_k = esn_forward_sequence(xs, state0, W_j, W_in_j,
                                           W_b_j, W_out_j)
    jax.block_until_ready(outs_k)

    # Pure-JAX f32 reference.
    outs_r, state_r = esn_reference(xs, state0, W_j, W_in_j, W_b_j, W_out_j)

    # Tolerance accounts for bf16 MXU weights vs the f32 reference (measured
    # drift over T=8 steps is a few 1e-3; 2e-2 leaves ample margin).
    np.testing.assert_allclose(np.asarray(state_k), np.asarray(state_r),
                               rtol=2e-2, atol=2e-2)
    np.testing.assert_allclose(np.asarray(outs_k), np.asarray(outs_r),
                               rtol=2e-2, atol=2e-2)
    print("KERNEL_OK")
</pallas_src>

<mosaic_0001>
module attributes {stable_mosaic.version = 11 : i64} {
  func.func @_esn_seq_kernel(%arg0: memref<8x1xf32, #tpu.memory_space<vmem>>, %arg1: memref<1x256xf32, #tpu.memory_space<vmem>>, %arg2: memref<256x256xbf16, #tpu.memory_space<vmem>>, %arg3: memref<1x256xf32, #tpu.memory_space<vmem>>, %arg4: memref<1x256xf32, #tpu.memory_space<vmem>>, %arg5: memref<256x128xbf16, #tpu.memory_space<vmem>>, %arg6: memref<1x256xf32, #tpu.memory_space<vmem>>, %arg7: memref<8x128xf32, #tpu.memory_space<vmem>>) attributes {dimension_semantics = [], scalar_prefetch = 0 : i64, scratch_operands = 0 : i64, tpu.core_type = #tpu.core_type<tc>} {
    %c0 = arith.constant 0 : index
    %c0_0 = arith.constant 0 : index
    %0 = vector.load %arg0[%c0, %c0_0] : memref<8x1xf32, #tpu.memory_space<vmem>>, vector<8x1xf32>
    %c0_1 = arith.constant 0 : index
    %c0_2 = arith.constant 0 : index
    %1 = vector.load %arg3[%c0_1, %c0_2] : memref<1x256xf32, #tpu.memory_space<vmem>>, vector<1x256xf32>
    %2 = vector.broadcast %0 : vector<8x1xf32> to vector<8x256xf32>
    %3 = vector.broadcast %1 : vector<1x256xf32> to vector<8x256xf32>
    %4 = arith.mulf %2, %3 : vector<8x256xf32>
    %c0_3 = arith.constant 0 : index
    %c0_4 = arith.constant 0 : index
    %5 = vector.load %arg4[%c0_3, %c0_4] : memref<1x256xf32, #tpu.memory_space<vmem>>, vector<1x256xf32>
    %6 = vector.broadcast %5 : vector<1x256xf32> to vector<8x256xf32>
    %7 = arith.addf %4, %6 : vector<8x256xf32>
    %c0_5 = arith.constant 0 : index
    %c0_6 = arith.constant 0 : index
    %8 = vector.load %arg2[%c0_5, %c0_6] : memref<256x256xbf16, #tpu.memory_space<vmem>>, vector<256x256xbf16>
    %c0_7 = arith.constant 0 : index
    %c0_8 = arith.constant 0 : index
    %9 = vector.load %arg1[%c0_7, %c0_8] : memref<1x256xf32, #tpu.memory_space<vmem>>, vector<1x256xf32>
    %10 = arith.truncf %9 : vector<1x256xf32> to vector<1x256xbf16>
    %cst = arith.constant dense<0.000000e+00> : vector<1x256xf32>
    %11 = tpu.matmul %10, %8, %cst {dimension_numbers = #tpu.dot_dimension_numbers<[1], [0], [0], [1], [0, 0, 1, 1], [], []>} : vector<1x256xbf16>, vector<256x256xbf16>, vector<1x256xf32> -> vector<1x256xf32>
    %12 = vector.extract_strided_slice %7 {offsets = [0, 0], sizes = [1, 256], strides = [1, 1]} : vector<8x256xf32> to vector<1x256xf32>
    %13 = arith.addf %12, %11 : vector<1x256xf32>
    %14 = math.tanh %13 : vector<1x256xf32>
    %15 = arith.truncf %14 : vector<1x256xf32> to vector<1x256xbf16>
    %cst_9 = arith.constant dense<0.000000e+00> : vector<1x256xf32>
    %16 = tpu.matmul %15, %8, %cst_9 {dimension_numbers = #tpu.dot_dimension_numbers<[1], [0], [0], [1], [0, 0, 1, 1], [], []>} : vector<1x256xbf16>, vector<256x256xbf16>, vector<1x256xf32> -> vector<1x256xf32>
    %17 = vector.extract_strided_slice %7 {offsets = [1, 0], sizes = [1, 256], strides = [1, 1]} : vector<8x256xf32> to vector<1x256xf32>
    %18 = arith.addf %17, %16 : vector<1x256xf32>
    %19 = math.tanh %18 : vector<1x256xf32>
    %20 = arith.truncf %19 : vector<1x256xf32> to vector<1x256xbf16>
    %cst_10 = arith.constant dense<0.000000e+00> : vector<1x256xf32>
    %21 = tpu.matmul %20, %8, %cst_10 {dimension_numbers = #tpu.dot_dimension_numbers<[1], [0], [0], [1], [0, 0, 1, 1], [], []>} : vector<1x256xbf16>, vector<256x256xbf16>, vector<1x256xf32> -> vector<1x256xf32>
    %22 = vector.extract_strided_slice %7 {offsets = [2, 0], sizes = [1, 256], strides = [1, 1]} : vector<8x256xf32> to vector<1x256xf32>
    %23 = arith.addf %22, %21 : vector<1x256xf32>
    %24 = math.tanh %23 : vector<1x256xf32>
    %25 = arith.truncf %24 : vector<1x256xf32> to vector<1x256xbf16>
    %cst_11 = arith.constant dense<0.000000e+00> : vector<1x256xf32>
    %26 = tpu.matmul %25, %8, %cst_11 {dimension_numbers = #tpu.dot_dimension_numbers<[1], [0], [0], [1], [0, 0, 1, 1], [], []>} : vector<1x256xbf16>, vector<256x256xbf16>, vector<1x256xf32> -> vector<1x256xf32>
    %27 = vector.extract_strided_slice %7 {offsets = [3, 0], sizes = [1, 256], strides = [1, 1]} : vector<8x256xf32> to vector<1x256xf32>
    %28 = arith.addf %27, %26 : vector<1x256xf32>
    %29 = math.tanh %28 : vector<1x256xf32>
    %30 = arith.truncf %29 : vector<1x256xf32> to vector<1x256xbf16>
    %cst_12 = arith.constant dense<0.000000e+00> : vector<1x256xf32>
    %31 = tpu.matmul %30, %8, %cst_12 {dimension_numbers = #tpu.dot_dimension_numbers<[1], [0], [0], [1], [0, 0, 1, 1], [], []>} : vector<1x256xbf16>, vector<256x256xbf16>, vector<1x256xf32> -> vector<1x256xf32>
    %32 = vector.extract_strided_slice %7 {offsets = [4, 0], sizes = [1, 256], strides = [1, 1]} : vector<8x256xf32> to vector<1x256xf32>
    %33 = arith.addf %32, %31 : vector<1x256xf32>
    %34 = math.tanh %33 : vector<1x256xf32>
    %35 = arith.truncf %34 : vector<1x256xf32> to vector<1x256xbf16>
    %cst_13 = arith.constant dense<0.000000e+00> : vector<1x256xf32>
    %36 = tpu.matmul %35, %8, %cst_13 {dimension_numbers = #tpu.dot_dimension_numbers<[1], [0], [0], [1], [0, 0, 1, 1], [], []>} : vector<1x256xbf16>, vector<256x256xbf16>, vector<1x256xf32> -> vector<1x256xf32>
    %37 = vector.extract_strided_slice %7 {offsets = [5, 0], sizes = [1, 256], strides = [1, 1]} : vector<8x256xf32> to vector<1x256xf32>
    %38 = arith.addf %37, %36 : vector<1x256xf32>
    %39 = math.tanh %38 : vector<1x256xf32>
    %40 = arith.truncf %39 : vector<1x256xf32> to vector<1x256xbf16>
    %cst_14 = arith.constant dense<0.000000e+00> : vector<1x256xf32>
    %41 = tpu.matmul %40, %8, %cst_14 {dimension_numbers = #tpu.dot_dimension_numbers<[1], [0], [0], [1], [0, 0, 1, 1], [], []>} : vector<1x256xbf16>, vector<256x256xbf16>, vector<1x256xf32> -> vector<1x256xf32>
    %42 = vector.extract_strided_slice %7 {offsets = [6, 0], sizes = [1, 256], strides = [1, 1]} : vector<8x256xf32> to vector<1x256xf32>
    %43 = arith.addf %42, %41 : vector<1x256xf32>
    %44 = math.tanh %43 : vector<1x256xf32>
    %45 = arith.truncf %44 : vector<1x256xf32> to vector<1x256xbf16>
    %cst_15 = arith.constant dense<0.000000e+00> : vector<1x256xf32>
    %46 = tpu.matmul %45, %8, %cst_15 {dimension_numbers = #tpu.dot_dimension_numbers<[1], [0], [0], [1], [0, 0, 1, 1], [], []>} : vector<1x256xbf16>, vector<256x256xbf16>, vector<1x256xf32> -> vector<1x256xf32>
    %47 = vector.extract_strided_slice %7 {offsets = [7, 0], sizes = [1, 256], strides = [1, 1]} : vector<8x256xf32> to vector<1x256xf32>
    %48 = arith.addf %47, %46 : vector<1x256xf32>
    %49 = math.tanh %48 : vector<1x256xf32>
    %c0_16 = arith.constant 0 : index
    %c0_17 = arith.constant 0 : index
    %50 = vector.load %arg6[%c0_16, %c0_17] : memref<1x256xf32, #tpu.memory_space<vmem>>, vector<1x256xf32>
    tpu.vector_store %arg6[%c0_16, %c0_17], %49 {strides = array<i32>} : memref<1x256xf32, #tpu.memory_space<vmem>>, vector<1x256xf32>,
    %51 = tpu.concatenate %14, %19, %24, %29, %34, %39, %44, %49 in 0 : vector<1x256xf32>, vector<1x256xf32>, vector<1x256xf32>, vector<1x256xf32>, vector<1x256xf32>, vector<1x256xf32>, vector<1x256xf32>, vector<1x256xf32> -> vector<8x256xf32>
    %52 = arith.truncf %51 : vector<8x256xf32> to vector<8x256xbf16>
    %c0_18 = arith.constant 0 : index
    %c0_19 = arith.constant 0 : index
    %53 = vector.load %arg5[%c0_18, %c0_19] : memref<256x128xbf16, #tpu.memory_space<vmem>>, vector<256x128xbf16>
    %cst_20 = arith.constant dense<0.000000e+00> : vector<8x128xf32>
    %54 = tpu.matmul %52, %53, %cst_20 {dimension_numbers = #tpu.dot_dimension_numbers<[1], [0], [0], [1], [0, 0, 1, 1], [], []>} : vector<8x256xbf16>, vector<256x128xbf16>, vector<8x128xf32> -> vector<8x128xf32>
    %c0_21 = arith.constant 0 : index
    %c0_22 = arith.constant 0 : index
    %55 = vector.load %arg7[%c0_21, %c0_22] : memref<8x128xf32, #tpu.memory_space<vmem>>, vector<8x128xf32>
    tpu.vector_store %arg7[%c0_21, %c0_22], %54 {strides = array<i32>} : memref<8x128xf32, #tpu.memory_space<vmem>>, vector<8x128xf32>,
    return
  }
}

</mosaic_0001>

<bundles_post_ra>
// kernel: tpu_custom_call.1
= control target key start
LH: loop header
LB: loop body
LE: loop exit
PB: predicated region body
PF: predicated region fallthrough
CT: control target
= control target key end

     0   :  { %13 = vsyncpa [#allocation3], 0  ;;  %s1750_s0 = inlined_call_operand.vmem [shape: f32[8,1], index: 0, kind: input, shape index: {}]   ;;  %s1751_s1 = inlined_call_operand.vmem [shape: f32[1,256], index: 1, kind: input, shape index: {}]   ;;  %s1752_s2 = inlined_call_operand.hbm [shape: bf16[256,256], index: 2, kind: input, shape index: {}]   ;;  %s1753_s3 = inlined_call_operand.vmem [shape: f32[1,256], index: 3, kind: input, shape index: {}]   ;;  %s1754_s4 = inlined_call_operand.vmem [shape: f32[1,256], index: 4, kind: input, shape index: {}]   ;;  %s1755_s5 = inlined_call_operand.hbm [shape: bf16[256,128], index: 5, kind: input, shape index: {}]   ;;  %s1756_s6 = inlined_call_operand.hbm [shape: f32[1,256], index: 6, kind: output, shape index: {0}]   ;;  %s1757_s7 = inlined_call_operand.hbm [shape: f32[8,128], index: 7, kind: output, shape index: {1}]  }
   0x1   :  { %14 = vsyncpa [#allocation6], 0 }
   0x2   :  { %15 = vsyncpa [#allocation4], 0 }
   0x3   :  { %16 = vsyncpa [#allocation9], 0  ;;  %s1278_s24 = smov [#allocation2]   ;;  %s1182_s28 = scalar_lea.hbm %s1752_s2, 4096 }
   0x4   :  { %s26_s25 = sshll.u32 %s1278_s24, 4  ;;  %p1183_p0 = scmp.ne.s32.totalorder %s1752_s2, %s1182_s28  ;;  %s27_s25 = int_to_ptr.vmem [resolvable:$true] %s26_s25 }
   0x5   :  { %p1186_p1 = scmp.lt.u32.totalorder %s1182_s28, %s1752_s2 }
   0x7   :  { %p1188_p2 = pnand %p1186_p1, %p1183_p0 }
   0x9   :  { %1191 = shalt.err (!%p1188_p2)
}
   0xa   :  { %s1192_s10 = scalar_lea.vmem %s27_s25, 4096  ;;  %p1197_p4 = scmp.lt.s32.totalorder %s27_s25, %s27_s25 }
   0xb   :  { %p1193_p3 = scmp.ne.s32.totalorder %s27_s25, %s1192_s10  ;;  %p1198_p5 = scmp.lt.s32.totalorder %s1192_s10, %s1192_s10 }
   0xd   :  { %p1199_p6 = por %p1198_p5, %p1197_p4 }
   0xf   :  { %p1200_p7 = pnand %p1199_p6, %p1193_p3 }
  0x11   :  { %1203 = shalt.err (!%p1200_p7)
}
  0x12   :  { %s1279_s11 = smov 128   ;;  %s1280_s12 = smov 8  }
  0x13   :  { %32 = dma.hbm_to_vmem [thread:$0]  %s1752_s2, 4096, %s27_s25, [#allocation3], %s1279_s11, %s1279_s11, %s1280_s12  }
  0x14   :  { %s1281_s15 = smov [#allocation5]   ;;  %s1204_s19 = scalar_lea.hbm %s1755_s5, 2048 }
  0x15   :  { %s42_s16 = sshll.u32 %s1281_s15, 4  ;;  %p1205_p8 = scmp.ne.s32.totalorder %s1755_s5, %s1204_s19  ;;  %s43_s16 = int_to_ptr.vmem [resolvable:$true] %s42_s16 }
  0x16   :  { %p1208_p9 = scmp.lt.u32.totalorder %s1204_s19, %s1755_s5 }
  0x18   :  { %p1210_p10 = pnand %p1208_p9, %p1205_p8 }
  0x1a   :  { %1213 = shalt.err (!%p1210_p10)
}
  0x1b   :  { %s1214_s24 = scalar_lea.vmem %s43_s16, 2048  ;;  %p1219_p12 = scmp.lt.s32.totalorder %s43_s16, %s43_s16 }
  0x1c   :  { %p1215_p11 = scmp.ne.s32.totalorder %s43_s16, %s1214_s24  ;;  %p1220_p13 = scmp.lt.s32.totalorder %s1214_s24, %s1214_s24 }
  0x1e   :  { %p1221_p0 = por %p1220_p13, %p1219_p12 }
  0x20   :  { %p1222_p1 = pnand %p1221_p0, %p1215_p11 }
  0x22   :  { %1225 = shalt.err (!%p1222_p1)
}
  0x23   :  { %s1282_s2 = smov 64   ;;  %s1283_s25 = smov 4  }
  0x24   :  { %48 = dma.hbm_to_vmem [thread:$0]  %s1755_s5, 2048, %s43_s16, [#allocation6], %s1282_s2, %s1282_s2, %s1283_s25  }
  0x25   :  { %1270 = dma.done.wait [#allocation3], 4096  }
  0x26   :  { %1271 = vsyncadd [#allocation3], 4294963200 }
  0x27   :  { %1272 = dma.done.wait [#allocation6], 2048  }
  0x28   :  { %1273 = vsyncadd [#allocation6], 4294965248  ;;  %v1284_v0 = vmov 0   ;;  %v1352_v1 = vld [vmem:[#allocation2 + $0x4] ss:$8 sps:$4 sm:$0xff]   ;;  %v64_v8 = vlaneseq  ;;  %vm783_vm0 = vcmask 1040384  }
  0x29   :  { %1085 = vset.pattern.permute.xlu0 %v1284_v0  ;;  %v1354_v2 = vld [vmem:[#allocation2] ss:$8 sps:$4 sm:$0xff]   ;;  %296 = vmatprep.subr.bf16.mxu0 %v1352_v1  ;;  %v1357_v3 = vld [vmem:[#allocation2 + $0x14] ss:$8 sps:$4 sm:$0xff]   ;;  %v1361_v4 = vld [vmem:[#allocation2 + $0x10] ss:$8 sps:$4 sm:$0xff]  }
  0x2a   :  { %343 = vmatprep.subr.bf16.mxu1 %v1352_v1  ;;  %297 = vmatpush1.bf16.msra.mxu0 %v1354_v2  ;;  %v1365_v5 = vld [vmem:[#allocation2 + $0x24] ss:$8 sps:$4 sm:$0xff]   ;;  %v1369_v6 = vld [vmem:[#allocation2 + $0x20] ss:$8 sps:$4 sm:$0xff]   ;;  %v1373_v7 = vld [vmem:[#allocation2 + $0x34] ss:$8 sps:$4 sm:$0xff]  }
  0x2b   :  { %344 = vmatpush1.bf16.msra.mxu1 %v1354_v2  ;;  %298 = vmatprep.subr.bf16.mxu0 %v1357_v3  ;;  %v1377_v9 = vld [vmem:[#allocation2 + $0x30] ss:$8 sps:$4 sm:$0xff]   ;;  %v1381_v10 = vld [vmem:[#allocation2 + $0x44] ss:$8 sps:$4 sm:$0xff]   ;;  %v1385_v11 = vshrl.u32 %v64_v8, 7  ;;  %vm786_vm1 = vcmask 1041408  }
  0x2c   :  { %345 = vmatprep.subr.bf16.mxu1 %v1357_v3  ;;  %v1388_v12 = vld [vmem:[#allocation2 + $0x40] ss:$8 sps:$4 sm:$0xff]   ;;  %v1392_v13 = vld [vmem:[#allocation2 + $0x54] ss:$8 sps:$4 sm:$0xff]   ;;  %v1399_v15 = vld [vmem:[#allocation2 + $0x50] ss:$8 sps:$4 sm:$0xff]  }
  0x2d   :  { %v1396_v14 = vsub.s32 1, %v1385_v11  ;;  %v1403_v16 = vld [vmem:[#allocation2 + $0x64] ss:$8 sps:$4 sm:$0xff]   ;;  %v122_v17 = vld [vmem:[%s1751_s1] sm:$0x3]  ;;  %v66_v37 = vsub.s32 0, %v1385_v11 }
  0x2e   :  { %299 = vmatpush1.bf16.msra.mxu0 %v1361_v4  ;;  %v56_v18 = vld [vmem:[%s1750_s0] sm:$0xff]  ;;  %v1414_v20 = vld [vmem:[#allocation2 + $0x74] ss:$8 sps:$4 sm:$0xff]   ;;  %v1421_v23 = vld [vmem:[#allocation2 + $0x70] ss:$8 sps:$4 sm:$0xff]   ;;  %vm789_vm2 = vcmask 1042432  }
  0x2f   :  { %346 = vmatpush1.bf16.msra.mxu1 %v1361_v4  ;;  %300 = vmatprep.subr.bf16.mxu0 %v1365_v5  ;;  %v1412_v19 = vld [vmem:[#allocation2 + $0x60] ss:$8 sps:$4 sm:$0xff]   ;;  %v131_v21 = vrot.slane %v122_v17, %v1396_v14  ;;  %v1423_v24 = vld [vmem:[#allocation2 + $0x84] ss:$8 sps:$4 sm:$0xff]   ;;  %v1431_v26 = vld [vmem:[#allocation2 + $0x94] ss:$8 sps:$4 sm:$0xff]   ;;  %v127_v40 = vrot.slane %v122_v17, %v66_v37 }
  0x30   :  { %347 = vmatprep.subr.bf16.mxu1 %v1365_v5  ;;  %60 = vperm.xlu0 %1085, %v56_v18   ;;  %v1429_v25 = vld [vmem:[#allocation2 + $0x80] ss:$8 sps:$4 sm:$0xff]   ;;  %v1438_v27 = vld [vmem:[#allocation2 + $0x90] ss:$8 sps:$4 sm:$0xff]   ;;  %v1442_v28 = vld [vmem:[#allocation2 + $0xa4] ss:$8 sps:$4 sm:$0xff]  }
  0x31   :  { %v135_v22 = vpack.c.bf16 %v131_v21, %v131_v21  ;;  %v1446_v29 = vld [vmem:[#allocation2 + $0xa0] ss:$8 sps:$4 sm:$0xff]   ;;  %v1450_v30 = vld [vmem:[#allocation2 + $0xb4] ss:$8 sps:$4 sm:$0xff]   ;;  %v1454_v31 = vld [vmem:[#allocation2 + $0xb0] ss:$8 sps:$4 sm:$0xff]   ;;  %v134_v42 = vpack.c.bf16 %v127_v40, %v127_v40 }
  0x32   :  { %301 = vmatpush1.bf16.msra.mxu0 %v1369_v6  ;;  %v1458_v32 = vld [vmem:[#allocation2 + $0xc4] ss:$8 sps:$4 sm:$0xff]   ;;  %v1462_v33 = vld [vmem:[#allocation2 + $0xc0] ss:$8 sps:$4 sm:$0xff]   ;;  %v1466_v34 = vld [vmem:[#allocation2 + $0xd4] ss:$8 sps:$4 sm:$0xff]  }
  0x33   :  { %348 = vmatpush1.bf16.msra.mxu1 %v1369_v6  ;;  %302 = vmatprep.subr.bf16.mxu0 %v1373_v7  ;;  %v1470_v35 = vld [vmem:[#allocation2 + $0xd0] ss:$8 sps:$4 sm:$0xff]   ;;  %v1474_v36 = vld [vmem:[#allocation2 + $0xe4] ss:$8 sps:$4 sm:$0xff]   ;;  %v1479_v38 = vld [vmem:[#allocation2 + $0xe0] ss:$8 sps:$4 sm:$0xff]  }
  0x34   :  { %349 = vmatprep.subr.bf16.mxu1 %v1373_v7  ;;  %328 = vmatprep.mubr.bf16.mxu0 %v135_v22  ;;  %v1483_v39 = vld [vmem:[#allocation2 + $0xf4] ss:$8 sps:$4 sm:$0xff]   ;;  %v1487_v41 = vld [vmem:[#allocation2 + $0xf0] ss:$8 sps:$4 sm:$0xff]   ;;  %v57_v43 = vld [vmem:[%s1753_s3] sm:$0x3] }
  0x35   :  { %v67_v44 = vrot.slane %v57_v43, %v66_v37  ;;  %v71_v45 = vrot.slane %v57_v43, %v1396_v14  ;;  %v76_v46 = vld [vmem:[%s1754_s4] sm:$0x3]  ;;  %vm792_vm3 = vcmask 1043456   ;;  %vm795_vm4 = vcmask 1044480   ;;  %s1286_s3 = smov [#allocation7]  }
  0x36   :  { %303 = vmatpush1.bf16.msra.mxu0 %v1377_v9  ;;  %v81_v48 = vrot.slane %v76_v46, %v66_v37  ;;  %v85_v50 = vrot.slane %v76_v46, %v1396_v14  ;;  %vm798_vm5 = vcmask 1045504   ;;  %vm801_vm6 = vcmask 1046528   ;;  %s981_s4 = sshll.u32 %s1286_s3, 4  ;;  %s982_s4 = int_to_ptr.vmem [resolvable:$true] %s981_s4 }
  0x37   :  { %350 = vmatpush1.bf16.msra.mxu1 %v1377_v9  ;;  %304 = vmatprep.subr.bf16.mxu0 %v1381_v10  ;;  %vm780_vm7 = vcmp.lt.s32.totalorder %v64_v8, 256  ;;  %s1226_s10 = scalar_lea.vmem %s982_s4, 32  ;;  %p1231_p3 = scmp.lt.s32.totalorder %s982_s4, %s982_s4 }
  0x38   :  { %351 = vmatprep.subr.bf16.mxu1 %v1381_v10  ;;  %p1227_p2 = scmp.ne.s32.totalorder %s982_s4, %s1226_s10  ;;  %p1232_p4 = scmp.lt.s32.totalorder %s1226_s10, %s1226_s10 }
  0x3a   :  { %305 = vmatpush1.bf16.msra.mxu0 %v1388_v12  ;;  %p1233_p5 = por %p1232_p4, %p1231_p3 }
  0x3b   :  { %352 = vmatpush1.bf16.msra.mxu1 %v1388_v12  ;;  %306 = vmatprep.subr.bf16.mxu0 %v1392_v13 }
  0x3c   :  { %353 = vmatprep.subr.bf16.mxu1 %v1392_v13  ;;  %p1234_p6 = pnand %p1233_p5, %p1227_p2 }
  0x3e   :  { %307 = vmatpush1.bf16.msra.mxu0 %v1399_v15 }
  0x3f   :  { %354 = vmatpush1.bf16.msra.mxu1 %v1399_v15  ;;  %308 = vmatprep.subr.bf16.mxu0 %v1403_v16 }
  0x40   :  { %355 = vmatprep.subr.bf16.mxu1 %v1403_v16 }
  0x42   :  { %309 = vmatpush1.bf16.msra.mxu0 %v1412_v19 }
  0x43   :  { %356 = vmatpush1.bf16.msra.mxu1 %v1412_v19  ;;  %310 = vmatprep.subr.bf16.mxu0 %v1414_v20 }
  0x44   :  { %357 = vmatprep.subr.bf16.mxu1 %v1414_v20 }
  0x46   :  { %311 = vmatpush1.bf16.msra.mxu0 %v1421_v23 }
  0x47   :  { %358 = vmatpush1.bf16.msra.mxu1 %v1421_v23  ;;  %312 = vmatprep.subr.bf16.mxu0 %v1423_v24 }
  0x48   :  { %359 = vmatprep.subr.bf16.mxu1 %v1423_v24 }
  0x4a   :  { %313 = vmatpush1.bf16.msra.mxu0 %v1429_v25 }
  0x4b   :  { %360 = vmatpush1.bf16.msra.mxu1 %v1429_v25  ;;  %314 = vmatprep.subr.bf16.mxu0 %v1431_v26 }
  0x4c   :  { %361 = vmatprep.subr.bf16.mxu1 %v1431_v26 }
  0x4e   :  { %315 = vmatpush1.bf16.msra.mxu0 %v1438_v27 }
  0x4f   :  { %362 = vmatpush1.bf16.msra.mxu1 %v1438_v27  ;;  %316 = vmatprep.subr.bf16.mxu0 %v1442_v28 }
  0x50   :  { %363 = vmatprep.subr.bf16.mxu1 %v1442_v28 }
  0x52   :  { %317 = vmatpush1.bf16.msra.mxu0 %v1446_v29 }
  0x53   :  { %364 = vmatpush1.bf16.msra.mxu1 %v1446_v29  ;;  %318 = vmatprep.subr.bf16.mxu0 %v1450_v30 }
  0x54   :  { %365 = vmatprep.subr.bf16.mxu1 %v1450_v30 }
  0x56   :  { %319 = vmatpush1.bf16.msra.mxu0 %v1454_v31 }
  0x57   :  { %366 = vmatpush1.bf16.msra.mxu1 %v1454_v31  ;;  %320 = vmatprep.subr.bf16.mxu0 %v1458_v32 }
  0x58   :  { %367 = vmatprep.subr.bf16.mxu1 %v1458_v32 }
  0x5a   :  { %321 = vmatpush1.bf16.msra.mxu0 %v1462_v33 }
  0x5b   :  { %368 = vmatpush1.bf16.msra.mxu1 %v1462_v33  ;;  %322 = vmatprep.subr.bf16.mxu0 %v1466_v34 }
  0x5c   :  { %369 = vmatprep.subr.bf16.mxu1 %v1466_v34 }
  0x5e   :  { %323 = vmatpush1.bf16.msra.mxu0 %v1470_v35 }
  0x5f   :  { %370 = vmatpush1.bf16.msra.mxu1 %v1470_v35  ;;  %324 = vmatprep.subr.bf16.mxu0 %v1474_v36 }
  0x60   :  { %371 = vmatprep.subr.bf16.mxu1 %v1474_v36 }
  0x62   :  { %325 = vmatpush1.bf16.msra.mxu0 %v1479_v38 }
  0x63   :  { %372 = vmatpush1.bf16.msra.mxu1 %v1479_v38  ;;  %326 = vmatprep.subr.bf16.mxu0 %v1483_v39 }
  0x64   :  { %373 = vmatprep.subr.bf16.mxu1 %v1483_v39 }
  0x66   :  { %327 = vmatpush1.bf16.msra.mxu0 %v1487_v41 }
  0x67   :  { %374 = vmatpush1.bf16.msra.mxu1 %v1487_v41  ;;  %404 = vmatprep.subr.bf16.mxu0 %v1352_v1 }
  0x68   :  { %463 = vmatprep.subr.bf16.mxu1 %v1352_v1 }
  0x69   :  { %329 = vmatmul.mubr.bf16.vlgmr.msra.gmra.mrb[0].mxu0 %v134_v42 }
  0x6a   :  { %405 = vmatpush1.bf16.msra.mxu0 %v1354_v2 }
  0x6b   :  { %406 = vmatprep.subr.bf16.mxu0 %v1357_v3 }
  0x6e   :  { %407 = vmatpush1.bf16.msra.mxu0 %v1361_v4 }
  0x6f   :  { %408 = vmatprep.subr.bf16.mxu0 %v1365_v5 }
  0x72   :  { %409 = vmatpush1.bf16.msra.mxu0 %v1369_v6 }
  0x73   :  { %410 = vmatprep.subr.bf16.mxu0 %v1373_v7 }
  0x76   :  { %411 = vmatpush1.bf16.msra.mxu0 %v1377_v9 }
  0x77   :  { %412 = vmatprep.subr.bf16.mxu0 %v1381_v10 }
  0x7a   :  { %413 = vmatpush1.bf16.msra.mxu0 %v1388_v12 }
  0x7b   :  { %414 = vmatprep.subr.bf16.mxu0 %v1392_v13 }
  0x7e   :  { %415 = vmatpush1.bf16.msra.mxu0 %v1399_v15 }
  0x7f   :  { %416 = vmatprep.subr.bf16.mxu0 %v1403_v16 }
  0x82   :  { %417 = vmatpush1.bf16.msra.mxu0 %v1412_v19 }
  0x83   :  { %418 = vmatprep.subr.bf16.mxu0 %v1414_v20 }
  0x86   :  { %419 = vmatpush1.bf16.msra.mxu0 %v1421_v23 }
  0x87   :  { %420 = vmatprep.subr.bf16.mxu0 %v1423_v24 }
  0x8a   :  { %421 = vmatpush1.bf16.msra.mxu0 %v1429_v25 }
  0x8b   :  { %422 = vmatprep.subr.bf16.mxu0 %v1431_v26 }
  0x8e   :  { %423 = vmatpush1.bf16.msra.mxu0 %v1438_v27 }
  0x8f   :  { %424 = vmatprep.subr.bf16.mxu0 %v1442_v28 }
  0x92   :  { %425 = vmatpush1.bf16.msra.mxu0 %v1446_v29 }
  0x93   :  { %426 = vmatprep.subr.bf16.mxu0 %v1450_v30 }
  0x96   :  { %427 = vmatpush1.bf16.msra.mxu0 %v1454_v31 }
  0x97   :  { %428 = vmatprep.subr.bf16.mxu0 %v1458_v32 }
  0x9a   :  { %429 = vmatpush1.bf16.msra.mxu0 %v1462_v33 }
  0x9b   :  { %430 = vmatprep.subr.bf16.mxu0 %v1466_v34 }
  0x9e   :  { %431 = vmatpush1.bf16.msra.mxu0 %v1470_v35 }
  0x9f   :  { %432 = vmatprep.subr.bf16.mxu0 %v1474_v36 }
  0xa2   :  { %433 = vmatpush1.bf16.msra.mxu0 %v1479_v38 }
  0xa3   :  { %434 = vmatprep.subr.bf16.mxu0 %v1483_v39 }
  0xa6   :  { %435 = vmatpush1.bf16.msra.mxu0 %v1487_v41 }
  0xa7   :  { %526 = vmatprep.subr.bf16.mxu0 %v1352_v1 }
  0xaf   :  { %v61_v47 = vpop.permute.xlu0 %60 }
  0xb0   :  { %v74_v49 = vmul.f32 %v67_v44, %v61_v47  ;;  %v75_v51 = vmul.f32 %v71_v45, %v61_v47 }
  0xb2   :  { %v1536_v52 = vadd.f32 %v81_v48, %v74_v49  ;;  %v1538_v53 = vadd.f32 %v85_v50, %v75_v51 }
 0x13c   :  { %v330_v54 = vpop.f32.mrb[0].mxu0 }
 0x13d   :  { %v337_v55 = vadd.f32 %v330_v54, %v1536_v52  ;;  %v332_v56 = vpop.f32.mrb[1].mxu0 }
 0x13e   :  { %v338_v57 = vadd.f32 %v332_v56, %v1538_v53  ;;  %v334_v58 = vpop.f32.mrb[2].mxu0 }
 0x13f   :  { %1150 = vtanh.f32 %v337_v55  ;;  %v335_v59 = vpop.f32.mrb[3].mxu0 }
 0x140   :  { %1152 = vtanh.f32 %v338_v57 }
 0x149   :  { %v1542_v60 = vpop.eup %1150 }
 0x14a   :  { %v1544_v61 = vpop.eup %1152  ;;  %v341_v63 = vpack.c.bf16 %v1542_v60, %v1542_v60 }
 0x14b   :  { %v342_v62 = vpack.c.bf16 %v1544_v61, %v1544_v61 }
 0x14d   :  { %375 = vmatprep.mubr.bf16.mxu1 %v342_v62 }
 0x14e   :  { %376 = vmatmul.mubr.bf16.vlgmr.msra.gmra.mrb[0].mxu1 %v341_v63 }
 0x14f   :  { %464 = vmatpush1.bf16.msra.mxu1 %v1354_v2 }
 0x150   :  { %465 = vmatprep.subr.bf16.mxu1 %v1357_v3 }
 0x153   :  { %466 = vmatpush1.bf16.msra.mxu1 %v1361_v4 }
 0x154   :  { %467 = vmatprep.subr.bf16.mxu1 %v1365_v5 }
 0x157   :  { %468 = vmatpush1.bf16.msra.mxu1 %v1369_v6 }
 0x158   :  { %469 = vmatprep.subr.bf16.mxu1 %v1373_v7 }
 0x15b   :  { %470 = vmatpush1.bf16.msra.mxu1 %v1377_v9 }
 0x15c   :  { %471 = vmatprep.subr.bf16.mxu1 %v1381_v10 }
 0x15f   :  { %472 = vmatpush1.bf16.msra.mxu1 %v1388_v12 }
 0x160   :  { %473 = vmatprep.subr.bf16.mxu1 %v1392_v13 }
 0x163   :  { %474 = vmatpush1.bf16.msra.mxu1 %v1399_v15 }
 0x164   :  { %475 = vmatprep.subr.bf16.mxu1 %v1403_v16 }
 0x167   :  { %476 = vmatpush1.bf16.msra.mxu1 %v1412_v19 }
 0x168   :  { %477 = vmatprep.subr.bf16.mxu1 %v1414_v20 }
 0x16b   :  { %478 = vmatpush1.bf16.msra.mxu1 %v1421_v23 }
 0x16c   :  { %479 = vmatprep.subr.bf16.mxu1 %v1423_v24 }
 0x16f   :  { %480 = vmatpush1.bf16.msra.mxu1 %v1429_v25 }
 0x170   :  { %481 = vmatprep.subr.bf16.mxu1 %v1431_v26 }
 0x173   :  { %482 = vmatpush1.bf16.msra.mxu1 %v1438_v27 }
 0x174   :  { %483 = vmatprep.subr.bf16.mxu1 %v1442_v28 }
 0x177   :  { %484 = vmatpush1.bf16.msra.mxu1 %v1446_v29 }
 0x178   :  { %485 = vmatprep.subr.bf16.mxu1 %v1450_v30 }
 0x17b   :  { %486 = vmatpush1.bf16.msra.mxu1 %v1454_v31 }
 0x17c   :  { %487 = vmatprep.subr.bf16.mxu1 %v1458_v32 }
 0x17f   :  { %488 = vmatpush1.bf16.msra.mxu1 %v1462_v33 }
 0x180   :  { %489 = vmatprep.subr.bf16.mxu1 %v1466_v34 }
 0x183   :  { %490 = vmatpush1.bf16.msra.mxu1 %v1470_v35 }
 0x184   :  { %491 = vmatprep.subr.bf16.mxu1 %v1474_v36 }
 0x187   :  { %492 = vmatpush1.bf16.msra.mxu1 %v1479_v38 }
 0x188   :  { %493 = vmatprep.subr.bf16.mxu1 %v1483_v39 }
 0x18b   :  { %494 = vmatpush1.bf16.msra.mxu1 %v1487_v41 }
 0x18c   :  { %585 = vmatprep.subr.bf16.mxu1 %v1352_v1 }
 0x221   :  { %v377_v0 = vpop.f32.mrb[0].mxu1 }
 0x222   :  { %v386_v14 = vrot.slane %v377_v0, 7  ;;  %v379_v17 = vpop.f32.mrb[1].mxu1 }
 0x223   :  { %v387_v18 = vrot.slane %v379_v17, 7  ;;  %v381_v21 = vpop.f32.mrb[2].mxu1 }
 0x224   :  { %v390_v22 = vadd.f32 %v386_v14, %v1536_v52  ;;  %v382_v37 = vpop.f32.mrb[3].mxu1 }
 0x225   :  { %v391_v40 = vadd.f32 %v387_v18, %v1538_v53 }
 0x226   :  { %1154 = vtanh.f32 %v390_v22 }
 0x227   :  { %1156 = vtanh.f32 %v391_v40 }
 0x230   :  { %v1155_v42 = vpop.eup %1154 }
 0x231   :  { %v1157_v43 = vpop.eup %1156  ;;  %v394_v44 = vpack.c.bf16 %v1155_v42, %v1155_v42  ;;  %v784_v59 = vsel %vm783_vm0, %v1542_v60, %v1155_v42 }
 0x232   :  { %v395_v45 = vpack.c.bf16 %v1157_v43, %v1157_v43  ;;  %v785_v0 = vsel %vm783_vm0, %v1544_v61, %v1157_v43 }
 0x233   :  { %v397_v47 = vshrl.u32 %v394_v44, 16 }
 0x234   :  { %v400_v46 = vshrl.u32 %v395_v45, 16 }
 0x236   :  { %436 = vmatprep.mubr.bf16.mxu0 %v400_v46 }
 0x237   :  { %437 = vmatmul.mubr.bf16.vlgmr.msra.gmra.mrb[4].mxu0 %v397_v47 }
 0x238   :  { %527 = vmatpush1.bf16.msra.mxu0 %v1354_v2 }
 0x239   :  { %528 = vmatprep.subr.bf16.mxu0 %v1357_v3 }
 0x23c   :  { %529 = vmatpush1.bf16.msra.mxu0 %v1361_v4 }
 0x23d   :  { %530 = vmatprep.subr.bf16.mxu0 %v1365_v5 }
 0x240   :  { %531 = vmatpush1.bf16.msra.mxu0 %v1369_v6 }
 0x241   :  { %532 = vmatprep.subr.bf16.mxu0 %v1373_v7 }
 0x244   :  { %533 = vmatpush1.bf16.msra.mxu0 %v1377_v9 }
 0x245   :  { %534 = vmatprep.subr.bf16.mxu0 %v1381_v10 }
 0x248   :  { %535 = vmatpush1.bf16.msra.mxu0 %v1388_v12 }
 0x249   :  { %536 = vmatprep.subr.bf16.mxu0 %v1392_v13 }
 0x24c   :  { %537 = vmatpush1.bf16.msra.mxu0 %v1399_v15 }
 0x24d   :  { %538 = vmatprep.subr.bf16.mxu0 %v1403_v16 }
 0x250   :  { %539 = vmatpush1.bf16.msra.mxu0 %v1412_v19 }
 0x251   :  { %540 = vmatprep.subr.bf16.mxu0 %v1414_v20 }
 0x254   :  { %541 = vmatpush1.bf16.msra.mxu0 %v1421_v23 }
 0x255   :  { %542 = vmatprep.subr.bf16.mxu0 %v1423_v24 }
 0x258   :  { %543 = vmatpush1.bf16.msra.mxu0 %v1429_v25 }
 0x259   :  { %544 = vmatprep.subr.bf16.mxu0 %v1431_v26 }
 0x25c   :  { %545 = vmatpush1.bf16.msra.mxu0 %v1438_v27 }
 0x25d   :  { %546 = vmatprep.subr.bf16.mxu0 %v1442_v28 }
 0x260   :  { %547 = vmatpush1.bf16.msra.mxu0 %v1446_v29 }
 0x261   :  { %548 = vmatprep.subr.bf16.mxu0 %v1450_v30 }
 0x264   :  { %549 = vmatpush1.bf16.msra.mxu0 %v1454_v31 }
 0x265   :  { %550 = vmatprep.subr.bf16.mxu0 %v1458_v32 }
 0x268   :  { %551 = vmatpush1.bf16.msra.mxu0 %v1462_v33 }
 0x269   :  { %552 = vmatprep.subr.bf16.mxu0 %v1466_v34 }
 0x26c   :  { %553 = vmatpush1.bf16.msra.mxu0 %v1470_v35 }
 0x26d   :  { %554 = vmatprep.subr.bf16.mxu0 %v1474_v36 }
 0x270   :  { %555 = vmatpush1.bf16.msra.mxu0 %v1479_v38 }
 0x271   :  { %556 = vmatprep.subr.bf16.mxu0 %v1483_v39 }
 0x274   :  { %557 = vmatpush1.bf16.msra.mxu0 %v1487_v41 }
 0x275   :  { %648 = vmatprep.subr.bf16.mxu0 %v1352_v1 }
 0x30a   :  { %v438_v48 = vpop.f32.mrb[4].mxu0 }
 0x30b   :  { %v447_v49 = vrot.slane %v438_v48, 6  ;;  %v440_v50 = vpop.f32.mrb[5].mxu0 }
 0x30c   :  { %v448_v51 = vrot.slane %v440_v50, 6  ;;  %v442_v54 = vpop.f32.mrb[6].mxu0 }
 0x30d   :  { %v451_v55 = vadd.f32 %v447_v49, %v1536_v52  ;;  %v443_v56 = vpop.f32.mrb[7].mxu0 }
 0x30e   :  { %v452_v57 = vadd.f32 %v448_v51, %v1538_v53 }
 0x30f   :  { %1158 = vtanh.f32 %v451_v55 }
 0x310   :  { %1160 = vtanh.f32 %v452_v57 }
 0x319   :  { %v1159_v58 = vpop.eup %1158 }
 0x31a   :  { %v1161_v62 = vpop.eup %1160  ;;  %v455_v63 = vpack.c.bf16 %v1159_v58, %v1159_v58  ;;  %v787_v14 = vsel %vm786_vm1, %v784_v59, %v1159_v58 }
 0x31b   :  { %v456_v17 = vpack.c.bf16 %v1161_v62, %v1161_v62  ;;  %v788_v18 = vsel %vm786_vm1, %v785_v0, %v1161_v62 }
 0x31c   :  { %v459_v22 = vrot.slane %v455_v63, 1 }
 0x31d   :  { %v460_v21 = vrot.slane %v456_v17, 1 }
 0x31f   :  { %495 = vmatprep.mubr.bf16.mxu1 %v460_v21 }
 0x320   :  { %496 = vmatmul.mubr.bf16.vlgmr.msra.gmra.mrb[4].mxu1 %v459_v22 }
 0x321   :  { %586 = vmatpush1.bf16.msra.mxu1 %v1354_v2 }
 0x322   :  { %587 = vmatprep.subr.bf16.mxu1 %v1357_v3 }
 0x325   :  { %588 = vmatpush1.bf16.msra.mxu1 %v1361_v4 }
 0x326   :  { %589 = vmatprep.subr.bf16.mxu1 %v1365_v5 }
 0x329   :  { %590 = vmatpush1.bf16.msra.mxu1 %v1369_v6 }
 0x32a   :  { %591 = vmatprep.subr.bf16.mxu1 %v1373_v7 }
 0x32d   :  { %592 = vmatpush1.bf16.msra.mxu1 %v1377_v9 }
 0x32e   :  { %593 = vmatprep.subr.bf16.mxu1 %v1381_v10 }
 0x331   :  { %594 = vmatpush1.bf16.msra.mxu1 %v1388_v12 }
 0x332   :  { %595 = vmatprep.subr.bf16.mxu1 %v1392_v13 }
 0x335   :  { %596 = vmatpush1.bf16.msra.mxu1 %v1399_v15 }
 0x336   :  { %597 = vmatprep.subr.bf16.mxu1 %v1403_v16 }
 0x339   :  { %598 = vmatpush1.bf16.msra.mxu1 %v1412_v19 }
 0x33a   :  { %599 = vmatprep.subr.bf16.mxu1 %v1414_v20 }
 0x33d   :  { %600 = vmatpush1.bf16.msra.mxu1 %v1421_v23 }
 0x33e   :  { %601 = vmatprep.subr.bf16.mxu1 %v1423_v24 }
 0x341   :  { %602 = vmatpush1.bf16.msra.mxu1 %v1429_v25 }
 0x342   :  { %603 = vmatprep.subr.bf16.mxu1 %v1431_v26 }
 0x345   :  { %604 = vmatpush1.bf16.msra.mxu1 %v1438_v27 }
 0x346   :  { %605 = vmatprep.subr.bf16.mxu1 %v1442_v28 }
 0x349   :  { %606 = vmatpush1.bf16.msra.mxu1 %v1446_v29 }
 0x34a   :  { %607 = vmatprep.subr.bf16.mxu1 %v1450_v30 }
 0x34d   :  { %608 = vmatpush1.bf16.msra.mxu1 %v1454_v31 }
 0x34e   :  { %609 = vmatprep.subr.bf16.mxu1 %v1458_v32 }
 0x351   :  { %610 = vmatpush1.bf16.msra.mxu1 %v1462_v33 }
 0x352   :  { %611 = vmatprep.subr.bf16.mxu1 %v1466_v34 }
 0x355   :  { %612 = vmatpush1.bf16.msra.mxu1 %v1470_v35 }
 0x356   :  { %613 = vmatprep.subr.bf16.mxu1 %v1474_v36 }
 0x359   :  { %614 = vmatpush1.bf16.msra.mxu1 %v1479_v38 }
 0x35a   :  { %615 = vmatprep.subr.bf16.mxu1 %v1483_v39 }
 0x35d   :  { %616 = vmatpush1.bf16.msra.mxu1 %v1487_v41 }
 0x35e   :  { %707 = vmatprep.subr.bf16.mxu1 %v1352_v1 }
 0x3f3   :  { %v497_v60 = vpop.f32.mrb[4].mxu1 }
 0x3f4   :  { %v506_v61 = vrot.slane %v497_v60, 5  ;;  %v499_v37 = vpop.f32.mrb[5].mxu1 }
 0x3f5   :  { %v507_v40 = vrot.slane %v499_v37, 5  ;;  %v501_v42 = vpop.f32.mrb[6].mxu1 }
 0x3f6   :  { %v510_v43 = vadd.f32 %v506_v61, %v1536_v52  ;;  %v502_v44 = vpop.f32.mrb[7].mxu1 }
 0x3f7   :  { %v511_v45 = vadd.f32 %v507_v40, %v1538_v53 }
 0x3f8   :  { %1162 = vtanh.f32 %v510_v43 }
 0x3f9   :  { %1164 = vtanh.f32 %v511_v45 }
 0x402   :  { %v1163_v46 = vpop.eup %1162 }
 0x403   :  { %v1165_v47 = vpop.eup %1164  ;;  %v514_v48 = vpack.c.bf16 %v1163_v46, %v1163_v46  ;;  %v790_v49 = vsel %vm789_vm2, %v787_v14, %v1163_v46 }
 0x404   :  { %v515_v50 = vpack.c.bf16 %v1165_v47, %v1165_v47  ;;  %v791_v51 = vsel %vm789_vm2, %v788_v18, %v1165_v47 }
 0x405   :  { %v517_v1 = vshrl.u32 %v514_v48, 16 }
 0x406   :  { %v521_v54 = vshrl.u32 %v515_v50, 16 }
 0x407   :  { %v519_v56 = vrot.slane %v517_v1, 1  ;;  %v1140_v1 = vld [vmem:[#allocation5 + $0x58] sm:$0xff]  }
 0x408   :  { %v523_v55 = vrot.slane %v521_v54, 1  ;;  %v1141_v54 = vld [vmem:[#allocation5 + $0x18] sm:$0xff]  }
 0x40a   :  { %558 = vmatprep.mubr.bf16.mxu0 %v523_v55  ;;  %v1142_v55 = vld [vmem:[#allocation5 + $0x60] sm:$0xff]  }
 0x40b   :  { %559 = vmatmul.mubr.bf16.vlgmr.msra.gmra.mrb[8].mxu0 %v519_v56  ;;  %v1143_v56 = vld [vmem:[#allocation5 + $0x20] sm:$0xff]  }
 0x40c   :  { %649 = vmatpush1.bf16.msra.mxu0 %v1354_v2 }
 0x40d   :  { %650 = vmatprep.subr.bf16.mxu0 %v1357_v3 }
 0x410   :  { %651 = vmatpush1.bf16.msra.mxu0 %v1361_v4 }
 0x411   :  { %652 = vmatprep.subr.bf16.mxu0 %v1365_v5 }
 0x414   :  { %653 = vmatpush1.bf16.msra.mxu0 %v1369_v6 }
 0x415   :  { %654 = vmatprep.subr.bf16.mxu0 %v1373_v7 }
 0x418   :  { %655 = vmatpush1.bf16.msra.mxu0 %v1377_v9 }
 0x419   :  { %656 = vmatprep.subr.bf16.mxu0 %v1381_v10 }
 0x41c   :  { %657 = vmatpush1.bf16.msra.mxu0 %v1388_v12 }
 0x41d   :  { %658 = vmatprep.subr.bf16.mxu0 %v1392_v13 }
 0x420   :  { %659 = vmatpush1.bf16.msra.mxu0 %v1399_v15 }
 0x421   :  { %660 = vmatprep.subr.bf16.mxu0 %v1403_v16 }
 0x424   :  { %661 = vmatpush1.bf16.msra.mxu0 %v1412_v19 }
 0x425   :  { %662 = vmatprep.subr.bf16.mxu0 %v1414_v20 }
 0x428   :  { %663 = vmatpush1.bf16.msra.mxu0 %v1421_v23 }
 0x429   :  { %664 = vmatprep.subr.bf16.mxu0 %v1423_v24 }
 0x42c   :  { %665 = vmatpush1.bf16.msra.mxu0 %v1429_v25 }
 0x42d   :  { %666 = vmatprep.subr.bf16.mxu0 %v1431_v26 }
 0x430   :  { %667 = vmatpush1.bf16.msra.mxu0 %v1438_v27 }
 0x431   :  { %668 = vmatprep.subr.bf16.mxu0 %v1442_v28 }
 0x434   :  { %669 = vmatpush1.bf16.msra.mxu0 %v1446_v29 }
 0x435   :  { %670 = vmatprep.subr.bf16.mxu0 %v1450_v30 }
 0x438   :  { %671 = vmatpush1.bf16.msra.mxu0 %v1454_v31 }
 0x439   :  { %672 = vmatprep.subr.bf16.mxu0 %v1458_v32 }
 0x43c   :  { %673 = vmatpush1.bf16.msra.mxu0 %v1462_v33 }
 0x43d   :  { %674 = vmatprep.subr.bf16.mxu0 %v1466_v34 }
 0x440   :  { %675 = vmatpush1.bf16.msra.mxu0 %v1470_v35 }
 0x441   :  { %676 = vmatprep.subr.bf16.mxu0 %v1474_v36 }
 0x444   :  { %677 = vmatpush1.bf16.msra.mxu0 %v1479_v38 }
 0x445   :  { %678 = vmatprep.subr.bf16.mxu0 %v1483_v39 }
 0x448   :  { %679 = vmatpush1.bf16.msra.mxu0 %v1487_v41 }
 0x4de   :  { %v560_v57 = vpop.f32.mrb[8].mxu0 }
 0x4df   :  { %v569_v58 = vrot.slane %v560_v57, 4  ;;  %v562_v59 = vpop.f32.mrb[9].mxu0  ;;  %v1144_v57 = vld [vmem:[#allocation5 + $0x68] sm:$0xff]  }
 0x4e0   :  { %v570_v62 = vrot.slane %v562_v59, 4  ;;  %v564_v63 = vpop.f32.mrb[10].mxu0  ;;  %v1146_v59 = vld [vmem:[#allocation5 + $0x70] sm:$0xff]  }
 0x4e1   :  { %v573_v0 = vadd.f32 %v569_v58, %v1536_v52  ;;  %v565_v14 = vpop.f32.mrb[11].mxu0  ;;  %v1145_v58 = vld [vmem:[#allocation5 + $0x28] sm:$0xff]   ;;  %v1148_v63 = vld [vmem:[#allocation5 + $0x78] sm:$0xff]  }
 0x4e2   :  { %v574_v17 = vadd.f32 %v570_v62, %v1538_v53  ;;  %v1147_v62 = vld [vmem:[#allocation5 + $0x30] sm:$0xff]  }
 0x4e3   :  { %1166 = vtanh.f32 %v573_v0  ;;  %v1149_v0 = vld [vmem:[#allocation5 + $0x38] sm:$0xff]  }
 0x4e4   :  { %1168 = vtanh.f32 %v574_v17 }
 0x4ed   :  { %v1167_v18 = vpop.eup %1166 }
 0x4ee   :  { %v1169_v21 = vpop.eup %1168  ;;  %v577_v22 = vpack.c.bf16 %v1167_v18, %v1167_v18  ;;  %v793_v60 = vsel %vm792_vm3, %v790_v49, %v1167_v18 }
 0x4ef   :  { %v578_v61 = vpack.c.bf16 %v1169_v21, %v1169_v21  ;;  %v794_v37 = vsel %vm792_vm3, %v791_v51, %v1169_v21 }
 0x4f0   :  { %v581_v42 = vrot.slane %v577_v22, 2 }
 0x4f1   :  { %v582_v40 = vrot.slane %v578_v61, 2 }
 0x4f3   :  { %617 = vmatprep.mubr.bf16.mxu1 %v582_v40  ;;  %v1285_v40 = vmov 1966171168  }
 0x4f4   :  { %618 = vmatmul.mubr.bf16.vlgmr.msra.gmra.mrb[8].mxu1 %v581_v42  ;;  %v762_v42 = vunpack.c.l.s4 %v1285_v40 }
 0x4f5   :  { %708 = vmatpush1.bf16.msra.mxu1 %v1354_v2 }
 0x4f6   :  { %709 = vmatprep.subr.bf16.mxu1 %v1357_v3 }
 0x4f9   :  { %710 = vmatpush1.bf16.msra.mxu1 %v1361_v4 }
 0x4fa   :  { %711 = vmatprep.subr.bf16.mxu1 %v1365_v5 }
 0x4fd   :  { %712 = vmatpush1.bf16.msra.mxu1 %v1369_v6 }
 0x4fe   :  { %713 = vmatprep.subr.bf16.mxu1 %v1373_v7 }
 0x501   :  { %714 = vmatpush1.bf16.msra.mxu1 %v1377_v9 }
 0x502   :  { %715 = vmatprep.subr.bf16.mxu1 %v1381_v10 }
 0x505   :  { %716 = vmatpush1.bf16.msra.mxu1 %v1388_v12 }
 0x506   :  { %717 = vmatprep.subr.bf16.mxu1 %v1392_v13 }
 0x509   :  { %718 = vmatpush1.bf16.msra.mxu1 %v1399_v15 }
 0x50a   :  { %719 = vmatprep.subr.bf16.mxu1 %v1403_v16 }
 0x50d   :  { %720 = vmatpush1.bf16.msra.mxu1 %v1412_v19 }
 0x50e   :  { %721 = vmatprep.subr.bf16.mxu1 %v1414_v20 }
 0x511   :  { %722 = vmatpush1.bf16.msra.mxu1 %v1421_v23 }
 0x512   :  { %723 = vmatprep.subr.bf16.mxu1 %v1423_v24 }
 0x515   :  { %724 = vmatpush1.bf16.msra.mxu1 %v1429_v25 }
 0x516   :  { %725 = vmatprep.subr.bf16.mxu1 %v1431_v26 }
 0x519   :  { %726 = vmatpush1.bf16.msra.mxu1 %v1438_v27  ;;  %v1134_v27 = vld [vmem:[#allocation5 + $0x40] sm:$0xff]  }
 0x51a   :  { %727 = vmatprep.subr.bf16.mxu1 %v1442_v28  ;;  %v1135_v28 = vld [vmem:[#allocation5] sm:$0xff]   ;;  %1053 = vmatprep.subr.bf16.mxu0 %v1134_v27 }
 0x51d   :  { %728 = vmatpush1.bf16.msra.mxu1 %v1446_v29  ;;  %v1136_v29 = vld [vmem:[#allocation5 + $0x48] sm:$0xff]  }
 0x51e   :  { %729 = vmatprep.subr.bf16.mxu1 %v1450_v30  ;;  %v1137_v30 = vld [vmem:[#allocation5 + $0x8] sm:$0xff]  }
 0x521   :  { %730 = vmatpush1.bf16.msra.mxu1 %v1454_v31  ;;  %v1138_v31 = vld [vmem:[#allocation5 + $0x50] sm:$0xff]  }
 0x522   :  { %731 = vmatprep.subr.bf16.mxu1 %v1458_v32  ;;  %v1139_v32 = vld [vmem:[#allocation5 + $0x10] sm:$0xff]  }
 0x525   :  { %732 = vmatpush1.bf16.msra.mxu1 %v1462_v33 }
 0x526   :  { %733 = vmatprep.subr.bf16.mxu1 %v1466_v34 }
 0x529   :  { %734 = vmatpush1.bf16.msra.mxu1 %v1470_v35 }
 0x52a   :  { %735 = vmatprep.subr.bf16.mxu1 %v1474_v36 }
 0x52d   :  { %736 = vmatpush1.bf16.msra.mxu1 %v1479_v38 }
 0x52e   :  { %737 = vmatprep.subr.bf16.mxu1 %v1483_v39 }
 0x531   :  { %738 = vmatpush1.bf16.msra.mxu1 %v1487_v41 }
 0x5c7   :  { %v619_v2 = vpop.f32.mrb[8].mxu1 }
 0x5c8   :  { %v628_v3 = vrot.slane %v619_v2, 3  ;;  %v621_v4 = vpop.f32.mrb[9].mxu1  ;;  %v763_v2 = vunpack.c.0.s8 %v762_v42 }
 0x5c9   :  { %v629_v5 = vrot.slane %v621_v4, 3  ;;  %v623_v6 = vpop.f32.mrb[10].mxu1 }
 0x5ca   :  { %v632_v7 = vadd.f32 %v628_v3, %v1536_v52  ;;  %v624_v9 = vpop.f32.mrb[11].mxu1  ;;  %v766_v4 = vsub.s32 %v763_v2, %v1385_v11 }
 0x5cb   :  { %v633_v10 = vadd.f32 %v629_v5, %v1538_v53 }
 0x5cc   :  { %1170 = vtanh.f32 %v632_v7 }
 0x5cd   :  { %1172 = vtanh.f32 %v633_v10 }
 0x5d6   :  { %v1171_v12 = vpop.eup %1170 }
 0x5d7   :  { %v1173_v13 = vpop.eup %1172  ;;  %v636_v15 = vpack.c.bf16 %v1171_v12, %v1171_v12  ;;  %v796_v16 = vsel %vm795_vm4, %v793_v60, %v1171_v12 }
 0x5d8   :  { %v637_v19 = vpack.c.bf16 %v1173_v13, %v1173_v13  ;;  %v797_v20 = vsel %vm795_vm4, %v794_v37, %v1173_v13 }
 0x5d9   :  { %v639_v23 = vshrl.u32 %v636_v15, 16 }
 0x5da   :  { %v643_v24 = vshrl.u32 %v637_v19, 16 }
 0x5db   :  { %v641_v26 = vrot.slane %v639_v23, 2 }
 0x5dc   :  { %v645_v25 = vrot.slane %v643_v24, 2 }
 0x5de   :  { %680 = vmatprep.mubr.bf16.mxu0 %v645_v25 }
 0x5df   :  { %681 = vmatmul.mubr.bf16.vlgmr.msra.gmra.mrb[12].mxu0 %v641_v26 }
 0x5e0   :  { %1054 = vmatpush3.bf16.msra.mxu0 %v1135_v28 }
 0x5e1   :  { %1055 = vmatprep.subr.bf16.mxu0 %v1136_v29 }
 0x5e4   :  { %1056 = vmatpush3.bf16.msra.mxu0 %v1137_v30 }
 0x5e5   :  { %1057 = vmatprep.subr.bf16.mxu0 %v1138_v31 }
 0x5e8   :  { %1058 = vmatpush3.bf16.msra.mxu0 %v1139_v32 }
 0x5e9   :  { %1059 = vmatprep.subr.bf16.mxu0 %v1140_v1 }
 0x5ec   :  { %1060 = vmatpush3.bf16.msra.mxu0 %v1141_v54 }
 0x5ed   :  { %1061 = vmatprep.subr.bf16.mxu0 %v1142_v55 }
 0x5f0   :  { %1062 = vmatpush3.bf16.msra.mxu0 %v1143_v56 }
 0x5f1   :  { %1063 = vmatprep.subr.bf16.mxu0 %v1144_v57 }
 0x5f4   :  { %1064 = vmatpush3.bf16.msra.mxu0 %v1145_v58 }
 0x5f5   :  { %1065 = vmatprep.subr.bf16.mxu0 %v1146_v59 }
 0x5f8   :  { %1066 = vmatpush3.bf16.msra.mxu0 %v1147_v62 }
 0x5f9   :  { %1067 = vmatprep.subr.bf16.mxu0 %v1148_v63 }
 0x5fc   :  { %1068 = vmatpush3.bf16.msra.mxu0 %v1149_v0 }
 0x6b2   :  { %v682_v33 = vpop.f32.mrb[12].mxu0 }
 0x6b3   :  { %v691_v34 = vrot.slane %v682_v33, 2  ;;  %v684_v35 = vpop.f32.mrb[13].mxu0 }
 0x6b4   :  { %v692_v36 = vrot.slane %v684_v35, 2  ;;  %v686_v38 = vpop.f32.mrb[14].mxu0 }
 0x6b5   :  { %v695_v39 = vadd.f32 %v691_v34, %v1536_v52  ;;  %v687_v41 = vpop.f32.mrb[15].mxu0 }
 0x6b6   :  { %v696_v43 = vadd.f32 %v692_v36, %v1538_v53 }
 0x6b7   :  { %1174 = vtanh.f32 %v695_v39 }
 0x6b8   :  { %1176 = vtanh.f32 %v696_v43 }
 0x6c1   :  { %v1175_v44 = vpop.eup %1174 }
 0x6c2   :  { %v1177_v45 = vpop.eup %1176  ;;  %v699_v46 = vpack.c.bf16 %v1175_v44, %v1175_v44  ;;  %v799_v47 = vsel %vm798_vm5, %v796_v16, %v1175_v44 }
 0x6c3   :  { %v700_v48 = vpack.c.bf16 %v1177_v45, %v1177_v45  ;;  %v800_v49 = vsel %vm798_vm5, %v797_v20, %v1177_v45 }
 0x6c4   :  { %v703_v51 = vrot.slane %v699_v46, 3 }
 0x6c5   :  { %v704_v50 = vrot.slane %v700_v48, 3 }
 0x6c7   :  { %739 = vmatprep.mubr.bf16.mxu1 %v704_v50 }
 0x6c8   :  { %740 = vmatmul.mubr.bf16.vlgmr.msra.gmra.mrb[12].mxu1 %v703_v51 }
 0x79b   :  { %v741_v14 = vpop.f32.mrb[12].mxu1 }
 0x79c   :  { %v750_v17 = vrot.slane %v741_v14, 1  ;;  %v743_v18 = vpop.f32.mrb[13].mxu1 }
 0x79d   :  { %v751_v21 = vrot.slane %v743_v18, 1  ;;  %v745_v22 = vpop.f32.mrb[14].mxu1 }
 0x79e   :  { %v754_v60 = vadd.f32 %v750_v17, %v1536_v52  ;;  %v746_v61 = vpop.f32.mrb[15].mxu1 }
 0x79f   :  { %v755_v37 = vadd.f32 %v751_v21, %v1538_v53 }
 0x7a0   :  { %1178 = vtanh.f32 %v754_v60 }
 0x7a1   :  { %1180 = vtanh.f32 %v755_v37 }
 0x7aa   :  { %v1179_v3 = vpop.eup %1178 }
 0x7ab   :  { %v1181_v5 = vpop.eup %1180  ;;  %v802_v6 = vsel %vm801_vm6, %v799_v47, %v1179_v3 }
 0x7ac   :  { %v803_v7 = vsel %vm801_vm6, %v800_v49, %v1181_v5  ;;  %v760_v9 = vcombine.high %v1179_v3, %v1181_v5  ;;  %v804_v12 = vpack.c.bf16 %v802_v6, %v802_v6 }
 0x7ad   :  { %v805_v10 = vpack.c.bf16 %v803_v7, %v803_v7 }
 0x7ae   :  { %v767_v13 = vrot.slane %v760_v9, %v766_v4 }
 0x7af   :  { %966 = vmatprep.mubr.bf16.mxu0 %v805_v10 }
 0x7b0   :  { %967 = vmatmul.mubr.bf16.vlgmr.msra.gmra.mrb[16].mxu0 %v804_v12  ;;  %v768_v52 = vcombine.high %v767_v13, %v767_v13 }
 0x7b2   :  { %v775_v53 = vrot.slane %v768_v52, %v766_v4 }
 0x7b4   :  { %v776_v15 = vcombine.high %v775_v53, %v775_v53 }
 0x7b6   :  { %782 = vst.msk [vmem:[#allocation7] sm:$0x3] %vm780_vm7, %v776_v15 }
 0x7b7   :  { %1237 = shalt.err (!%p1234_p6)
}
 0x7b8   :  { %s1238_s13 = scalar_lea.hbm %s1756_s6, 32 }
 0x7b9   :  { %p1239_p7 = scmp.ne.s32.totalorder %s1756_s6, %s1238_s13  ;;  %p1242_p8 = scmp.lt.u32.totalorder %s1238_s13, %s1756_s6 }
 0x7bb   :  { %p1244_p9 = pnand %p1242_p8, %p1239_p7 }
 0x7bd   :  { %1247 = shalt.err (!%p1244_p9)
}
 0x7be   :  { %984 = dma.vmem_to_hbm [thread:$0]  %s982_s4, 32, %s1756_s6, [#allocation4]  }
 0x7bf   :  { %s1287_s20 = smov [#allocation8]  }
 0x7c0   :  { %s991_s21 = sshll.u32 %s1287_s20, 4  ;;  %s992_s21 = int_to_ptr.vmem [resolvable:$true] %s991_s21 }
 0x7c1   :  { %s1248_s22 = scalar_lea.vmem %s992_s21, 128  ;;  %p1253_p11 = scmp.lt.s32.totalorder %s992_s21, %s992_s21 }
 0x7c2   :  { %p1249_p10 = scmp.ne.s32.totalorder %s992_s21, %s1248_s22  ;;  %p1254_p12 = scmp.lt.s32.totalorder %s1248_s22, %s1248_s22 }
 0x7c4   :  { %p1255_p13 = por %p1254_p12, %p1253_p11 }
 0x7c6   :  { %p1256_p0 = pnand %p1255_p13, %p1249_p10 }
 0x883   :  { %v1069_v8 = vpop.f32.mrb[16].mxu0 }
 0x884   :  { %v1070_v11 = vpop.f32.mrb[17].mxu0 }
 0x885   :  { %v1071_v16 = vadd.f32 %v1070_v11, %v1069_v8  ;;  %v1072_v19 = vpop.f32.mrb[18].mxu0 }
 0x886   :  { %v1073_v20 = vpop.f32.mrb[19].mxu0 }
 0x887   :  { %974 = vst [vmem:[#allocation8] sm:$0xff] %v1071_v16 }
 0x888   :  { %1259 = shalt.err (!%p1256_p0)
}
 0x889   :  { %s1260_s6 = scalar_lea.hbm %s1757_s7, 128 }
 0x88a   :  { %p1261_p1 = scmp.ne.s32.totalorder %s1757_s7, %s1260_s6  ;;  %p1264_p2 = scmp.lt.u32.totalorder %s1260_s6, %s1757_s7 }
 0x88c   :  { %p1266_p3 = pnand %p1264_p2, %p1261_p1 }
 0x88e   :  { %1269 = shalt.err (!%p1266_p3)
}
 0x88f   :  { %994 = dma.vmem_to_hbm [thread:$0]  %s992_s21, 128, %s1757_s7, [#allocation9]  }
 0x890   :  { %1274 = dma.done.wait [#allocation4], 32  }
 0x891   :  { %1275 = vsyncadd [#allocation4], 4294967264 }
 0x892   :  { %1276 = dma.done.wait [#allocation9], 128  }
 0x893   :  { %1277 = vsyncadd [#allocation9], 4294967168 }
 0x894   :  { %1001 = vsyncpa [#allocation3], 1 }
 0x895   :  { %1002 = vsyncpa [#allocation6], 1 }
 0x896   :  { %1003 = vsyncpa [#allocation4], 1 }
 0x897   :  { %1004 = vsyncpa [#allocation9], 1 }

</bundles_post_ra>
